<compile_context>
chip_gen: v6e
topology: v6e:2x2x1
jax: 0.10.0
libtpu: 0.0.40
codegen_flags: <defaults>
</compile_context>

<pallas_src>
import functools

import jax
import jax.numpy as jnp
from jax.experimental import pallas as pl
from jax.experimental.pallas import tpu as pltpu


def _round_up(x, m):
    return ((x + m - 1) // m) * m


def _contrastive_loss_kernel(o1_ref, o2_ref, label_ref, out_ref, acc_ref, *,
                             margin, eps, n_valid, block_rows, tiles_per_part):
    p = pl.program_id(0)              # parallel partition (TensorCore on v7x)
    t = pl.program_id(1)              # sequential tile index within partition

    @pl.when(t == 0)
    def _init():
        acc_ref[...] = jnp.zeros_like(acc_ref)

    # Cast after the DMA so HBM traffic stays at the native input dtype.
    o1 = o1_ref[...].astype(jnp.float32)                     # (TN, D)
    o2 = o2_ref[...].astype(jnp.float32)                     # (TN, D)
    diff = o1 - o2 + eps                                      # VPU
    sq_dist = jnp.sum(diff * diff, axis=1, keepdims=True)     # (TN, 1)  XLU
    dist = jnp.sqrt(sq_dist)                                  # EUP

    lab = label_ref[...].astype(jnp.float32)                  # (TN, 1)
    hinge = jnp.maximum(margin - dist, 0.0)
    # Positive term reuses sq_dist directly (no sqrt -> square round trip).
    per_row = (1.0 - lab) * sq_dist + lab * (hinge * hinge)   # (TN, 1)

    # Mask rows past the true batch: partial trailing tile (unpadded inputs)
    # and fully out-of-range tiles (clamped in the index_map).  jnp.where, not
    # a multiply-mask, so garbage/NaN read past the edge cannot propagate.
    tile = p * tiles_per_part + t
    row = tile * block_rows + jax.lax.broadcasted_iota(jnp.int32, per_row.shape, 0)
    per_row = jnp.where(row < n_valid, per_row, 0.0)

    # Lane-resident accumulation; reduced only once, in the finalize step.
    acc_ref[...] += per_row

    @pl.when(t == pl.num_programs(1) - 1)
    def _finalize():
        total = jnp.sum(acc_ref[...], axis=0, keepdims=True)  # (1, 1)
        out_ref[...] = total[None]                            # (1, 1, 1)


def contrastive_loss(output1, output2, label, margin=2.0, eps=1e-6,
                     vmem_budget_bytes=8 * 1024 * 1024):
    """Pallas TPU implementation of ContrastiveLoss.forward (returns a scalar)."""
    n, d = output1.shape
    assert output2.shape == (n, d)

    in_itemsize = jnp.dtype(output1.dtype).itemsize
    d_pad = _round_up(d, 128)

    # Generation-aware VMEM ceiling (v7x: 64 MiB/TC, v5e/v6e: 128 MiB).
    try:
        vmem_cap = int(pltpu.get_tpu_info().vmem_capacity_bytes)
    except Exception:  # conservative fallback (v7x per-core size)
        vmem_cap = 64 * 1024 * 1024
    eff_budget = min(int(vmem_budget_bytes), vmem_cap // 4)

    # --- VMEM accounting: bytes resident in VMEM per batch row ---------------
    bytes_per_row = (
        2 * 2 * d_pad * in_itemsize   # 2 feature inputs x 2 pipeline buffers
        + 4 * d_pad * 4               # f32 temporaries from the in-kernel cast
        + 2 * 128 * 4                 # label tile (lane-padded to 128) x 2 buffers
        + 128 * 4                     # (block_rows, 1) f32 accumulator (lane-padded)
        + 8 * 128 * 4                 # epilogue temporaries (sq_dist/dist/hinge/...)
    )
    block_rows = (eff_budget // bytes_per_row) // 8 * 8
    # Keep each feature DMA tile modest (~4 MiB): already ~85% of HBM roofline,
    # and halves VMEM / live-range pressure on v7x's 64 MiB per-core VMEM.
    tile_cap = max(8, ((4 * 1024 * 1024) // (d_pad * in_itemsize)) // 8 * 8)
    block_rows = int(max(8, min(block_rows, tile_cap, 2048, _round_up(n, 8))))

    n_tiles = -(-n // block_rows)
    # Split tiles over a leading "parallel" axis: on v7x each TensorCore reduces
    # half the tiles into its own partial sum (added in the wrapper).
    num_parts = 2 if n_tiles >= 2 else 1
    tiles_per_part = -(-n_tiles // num_parts)
    grid = (num_parts, tiles_per_part)

    # No padding of the feature matrices.  The trailing partial tile reads past
    # the array edge (masked in-kernel); tile indices beyond n_tiles (when
    # num_parts * tiles_per_part > n_tiles) are clamped to a valid block here
    # and likewise masked in-kernel.
    last_tile = n_tiles - 1

    def tile_map(pi, ti):
        return (jnp.minimum(pi * tiles_per_part + ti, last_tile), 0)

    lab = label.reshape(n, 1).astype(jnp.float32)

    # vmem_limit derived from the real footprint (+ headroom), capped to half
    # of the physical per-core VMEM.
    footprint = block_rows * bytes_per_row + (1 << 20)
    vmem_limit = int(min(max(2 * footprint, 16 * 1024 * 1024), vmem_cap // 2))

    kernel = functools.partial(
        _contrastive_loss_kernel,
        margin=float(margin), eps=float(eps),
        n_valid=n, block_rows=block_rows, tiles_per_part=tiles_per_part)

    partials = pl.pallas_call(
        kernel,
        out_shape=jax.ShapeDtypeStruct((num_parts, 1, 1), jnp.float32),
        grid=grid,
        in_specs=[
            pl.BlockSpec((block_rows, d), tile_map),
            pl.BlockSpec((block_rows, d), tile_map),
            pl.BlockSpec((block_rows, 1), tile_map),
        ],
        out_specs=pl.BlockSpec((1, 1, 1), lambda pi, ti: (pi, 0, 0)),
        scratch_shapes=[pltpu.VMEM((block_rows, 1), jnp.float32)],
        compiler_params=pltpu.CompilerParams(
            dimension_semantics=("parallel", "arbitrary"),
            vmem_limit_bytes=vmem_limit,
        ),
    )(output1, output2, lab)

    # Sum the per-partition partials (also numerically nicer than one long
    # running scalar) and take the mean.
    return jnp.sum(partials) / jnp.float32(n)


def _reference_loss(output1, output2, label, margin=2.0, eps=1e-6):
    # Pure-JAX reference mirroring torch semantics (correctness check).
    diff = output1.astype(jnp.float32) - output2.astype(jnp.float32) + eps
    d = jnp.sqrt(jnp.sum(diff * diff, axis=1))
    return jnp.mean((1.0 - label) * d ** 2
                    + label * jnp.maximum(margin - d, 0.0) ** 2)


if __name__ == "__main__":
    key = jax.random.PRNGKey(0)
    k1, k2, k3, k4, k5, k6 = jax.random.split(key, 6)

    # Siamese-network embedding pairs: batch of 8, hidden dim 32.
    N, D = 8, 32
    o1 = jax.random.normal(k1, (N, D), dtype=jnp.float32)
    o2 = jax.random.normal(k2, (N, D), dtype=jnp.float32)
    lab = jax.random.bernoulli(k3, 0.5, (N,)).astype(jnp.float32)

    loss = jax.block_until_ready(contrastive_loss(o1, o2, lab, margin=2.0))
    ref = _reference_loss(o1, o2, lab, margin=2.0)
    assert jnp.allclose(loss, ref, rtol=1e-5, atol=1e-5), (loss, ref)

    # Multi-tile path: non-multiple batch size (no wrapper-side padding),
    # bf16 streaming with in-kernel f32 cast, partial trailing tile, a clamped
    # out-of-range tile, and both grid partitions exercised.
    N2, D2 = 300, 256
    o1b = jax.random.normal(k4, (N2, D2), dtype=jnp.float32).astype(jnp.bfloat16)
    o2b = jax.random.normal(k5, (N2, D2), dtype=jnp.float32).astype(jnp.bfloat16)
    lab2 = jax.random.bernoulli(k6, 0.5, (N2,)).astype(jnp.float32)

    loss2 = jax.block_until_ready(
        contrastive_loss(o1b, o2b, lab2, margin=2.0,
                         vmem_budget_bytes=256 * 1024))
    ref2 = _reference_loss(o1b, o2b, lab2, margin=2.0)
    assert jnp.allclose(loss2, ref2, rtol=1e-4, atol=1e-4), (loss2, ref2)

    print("KERNEL_OK")
</pallas_src>

<mosaic_0001>
module attributes {stable_mosaic.version = 11 : i64} {
  func.func @_contrastive_loss_kernel(%arg0: i32, %arg1: i32, %arg2: memref<8x32xf32, #tpu.memory_space<vmem>>, %arg3: memref<8x32xf32, #tpu.memory_space<vmem>>, %arg4: memref<8x1xf32, #tpu.memory_space<vmem>>, %arg5: memref<1x1x1xf32, #tpu.memory_space<vmem>>, %arg6: memref<8x1xf32, #tpu.memory_space<vmem>>) attributes {dimension_semantics = [#tpu.dimension_semantics<parallel>, #tpu.dimension_semantics<arbitrary>], iteration_bounds = array<i64: 1, 1>, scalar_prefetch = 0 : i64, scratch_operands = 1 : i64, tpu.core_type = #tpu.core_type<tc>, window_params = [{transform_indices = @transform_0, window_bounds = array<i64: 8, 32>}, {transform_indices = @transform_1, window_bounds = array<i64: 8, 32>}, {transform_indices = @transform_2, window_bounds = array<i64: 8, 1>}, {transform_indices = @transform_3, window_bounds = array<i64: 1, 1, 1>}]} {
    %c0_i32 = arith.constant 0 : i32
    %0 = arith.cmpi eq, %arg1, %c0_i32 : i32
    %1 = arith.extui %0 : i1 to i32
    %c0_i32_0 = arith.constant 0 : i32
    %2 = arith.cmpi ne, %1, %c0_i32_0 : i32
    scf.if %2 {
      %cst_18 = arith.constant 0.000000e+00 : f32
      %39 = vector.broadcast %cst_18 : f32 to vector<8x1xf32>
      %c0_19 = arith.constant 0 : index
      %c0_20 = arith.constant 0 : index
      %40 = vector.load %arg6[%c0_19, %c0_20] : memref<8x1xf32, #tpu.memory_space<vmem>>, vector<8x1xf32>
      tpu.vector_store %arg6[%c0_19, %c0_20], %39 {strides = array<i32>} : memref<8x1xf32, #tpu.memory_space<vmem>>, vector<8x1xf32>,
    } else {
    }
    %c0 = arith.constant 0 : index
    %c0_1 = arith.constant 0 : index
    %3 = vector.load %arg2[%c0, %c0_1] : memref<8x32xf32, #tpu.memory_space<vmem>>, vector<8x32xf32>
    %c0_2 = arith.constant 0 : index
    %c0_3 = arith.constant 0 : index
    %4 = vector.load %arg3[%c0_2, %c0_3] : memref<8x32xf32, #tpu.memory_space<vmem>>, vector<8x32xf32>
    %5 = arith.subf %3, %4 : vector<8x32xf32>
    %cst = arith.constant 9.99999997E-7 : f32
    %6 = vector.broadcast %cst : f32 to vector<8x32xf32>
    %7 = arith.addf %5, %6 : vector<8x32xf32>
    %8 = arith.mulf %7, %7 : vector<8x32xf32>
    %cst_4 = arith.constant dense<0.000000e+00> : vector<8xf32>
    %9 = vector.multi_reduction <add>, %8, %cst_4 [1] : vector<8x32xf32> to vector<8xf32>
    %10 = vector.shape_cast %9 : vector<8xf32> to vector<8x1xf32>
    %11 = math.sqrt %10 : vector<8x1xf32>
    %c0_5 = arith.constant 0 : index
    %c0_6 = arith.constant 0 : index
    %12 = vector.load %arg4[%c0_5, %c0_6] : memref<8x1xf32, #tpu.memory_space<vmem>>, vector<8x1xf32>
    %cst_7 = arith.constant 2.000000e+00 : f32
    %13 = vector.broadcast %cst_7 : f32 to vector<8x1xf32>
    %14 = arith.subf %13, %11 : vector<8x1xf32>
    %cst_8 = arith.constant 0.000000e+00 : f32
    %15 = vector.broadcast %cst_8 : f32 to vector<8x1xf32>
    %16 = arith.maximumf %14, %15 : vector<8x1xf32>
    %cst_9 = arith.constant 1.000000e+00 : f32
    %17 = vector.broadcast %cst_9 : f32 to vector<8x1xf32>
    %18 = arith.subf %17, %12 : vector<8x1xf32>
    %19 = arith.mulf %18, %10 : vector<8x1xf32>
    %20 = arith.mulf %16, %16 : vector<8x1xf32>
    %21 = arith.mulf %12, %20 : vector<8x1xf32>
    %22 = arith.addf %19, %21 : vector<8x1xf32>
    %c1_i32 = arith.constant 1 : i32
    %23 = arith.muli %arg0, %c1_i32 : i32
    %24 = arith.addi %23, %arg1 : i32
    %c8_i32 = arith.constant 8 : i32
    %25 = arith.muli %24, %c8_i32 : i32
    %26 = tpu.iota {dimensions = array<i32: 0>} : vector<8x1xi32>
    %27 = vector.broadcast %25 : i32 to vector<8x1xi32>
    %28 = arith.addi %27, %26 : vector<8x1xi32>
    %c8_i32_10 = arith.constant 8 : i32
    %29 = vector.broadcast %c8_i32_10 : i32 to vector<8x1xi32>
    %30 = arith.cmpi slt, %28, %29 : vector<8x1xi32>
    %cst_11 = arith.constant 0.000000e+00 : f32
    %31 = vector.broadcast %cst_11 : f32 to vector<8x1xf32>
    %32 = arith.select %30, %22, %31 : vector<8x1xi1>, vector<8x1xf32>
    %c0_12 = arith.constant 0 : index
    %c0_13 = arith.constant 0 : index
    %33 = vector.load %arg6[%c0_12, %c0_13] : memref<8x1xf32, #tpu.memory_space<vmem>>, vector<8x1xf32>
    %34 = arith.addf %33, %32 : vector<8x1xf32>
    %c0_14 = arith.constant 0 : index
    %c0_15 = arith.constant 0 : index
    %35 = vector.load %arg6[%c0_14, %c0_15] : memref<8x1xf32, #tpu.memory_space<vmem>>, vector<8x1xf32>
    tpu.vector_store %arg6[%c0_14, %c0_15], %34 {strides = array<i32>} : memref<8x1xf32, #tpu.memory_space<vmem>>, vector<8x1xf32>,
    %c0_i32_16 = arith.constant 0 : i32
    %36 = arith.cmpi eq, %arg1, %c0_i32_16 : i32
    %37 = arith.extui %36 : i1 to i32
    %c0_i32_17 = arith.constant 0 : i32
    %38 = arith.cmpi ne, %37, %c0_i32_17 : i32
    scf.if %38 {
      %c0_18 = arith.constant 0 : index
      %c0_19 = arith.constant 0 : index
      %39 = vector.load %arg6[%c0_18, %c0_19] : memref<8x1xf32, #tpu.memory_space<vmem>>, vector<8x1xf32>
      %cst_20 = arith.constant dense<0.000000e+00> : vector<1xf32>
      %40 = vector.multi_reduction <add>, %39, %cst_20 [0] : vector<8x1xf32> to vector<1xf32>
      %41 = vector.shape_cast %40 : vector<1xf32> to vector<1x1xf32>
      %42 = vector.shape_cast %41 : vector<1x1xf32> to vector<1x1x1xf32>
      %c0_21 = arith.constant 0 : index
      %c0_22 = arith.constant 0 : index
      %c0_23 = arith.constant 0 : index
      %43 = vector.load %arg5[%c0_21, %c0_22, %c0_23] : memref<1x1x1xf32, #tpu.memory_space<vmem>>, vector<1x1x1xf32>
      tpu.vector_store %arg5[%c0_21, %c0_22, %c0_23], %42 {strides = array<i32>} : memref<1x1x1xf32, #tpu.memory_space<vmem>>, vector<1x1x1xf32>,
    } else {
    }
    return
  }
  func.func @transform_0(%arg0: i32, %arg1: i32) -> (i32, i32) {
    %c1_i32 = arith.constant 1 : i32
    %0 = arith.muli %arg0, %c1_i32 : i32
    %1 = arith.addi %0, %arg1 : i32
    %c0_i32 = arith.constant 0 : i32
    %2 = arith.minsi %1, %c0_i32 : i32
    %c0_i32_0 = arith.constant 0 : i32
    %c0_i32_1 = arith.constant 0 : i32
    return %2, %c0_i32_0 : i32, i32
  }
  func.func @transform_1(%arg0: i32, %arg1: i32) -> (i32, i32) {
    %c1_i32 = arith.constant 1 : i32
    %0 = arith.muli %arg0, %c1_i32 : i32
    %1 = arith.addi %0, %arg1 : i32
    %c0_i32 = arith.constant 0 : i32
    %2 = arith.minsi %1, %c0_i32 : i32
    %c0_i32_0 = arith.constant 0 : i32
    %c0_i32_1 = arith.constant 0 : i32
    return %2, %c0_i32_0 : i32, i32
  }
  func.func @transform_2(%arg0: i32, %arg1: i32) -> (i32, i32) {
    %c1_i32 = arith.constant 1 : i32
    %0 = arith.muli %arg0, %c1_i32 : i32
    %1 = arith.addi %0, %arg1 : i32
    %c0_i32 = arith.constant 0 : i32
    %2 = arith.minsi %1, %c0_i32 : i32
    %c0_i32_0 = arith.constant 0 : i32
    %c0_i32_1 = arith.constant 0 : i32
    return %2, %c0_i32_0 : i32, i32
  }
  func.func @transform_3(%arg0: i32, %arg1: i32) -> (i32, i32, i32) {
    %c0_i32 = arith.constant 0 : i32
    %c0_i32_0 = arith.constant 0 : i32
    %c0_i32_1 = arith.constant 0 : i32
    return %arg0, %c0_i32, %c0_i32_0 : i32, i32, i32
  }
}

</mosaic_0001>

<bundles_post_ra>
// kernel: tpu_custom_call.1
= control target key start
LH: loop header
LB: loop body
LE: loop exit
PB: predicated region body
PF: predicated region fallthrough
CT: control target
= control target key end

     0   :  { %8 = vsyncpa [#allocation4], 0  ;;  %s260_s0 = inlined_call_operand.vmem [shape: f32[8,32], index: 0, kind: input, shape index: {}]   ;;  %s261_s1 = inlined_call_operand.hbm [shape: f32[8,32], index: 1, kind: input, shape index: {}]   ;;  %s262_s2 = inlined_call_operand.vmem [shape: f32[8,1], index: 2, kind: input, shape index: {}]   ;;  %s263_s3 = inlined_call_operand.hbm [shape: f32[1,1,1], index: 3, kind: output, shape index: {}]  }
   0x1   :  { %9 = vsyncpa [#allocation5], 0  ;;  %s222_s12 = smov [#allocation3]  }
   0x2   :  { %s33_s13 = sshll.u32 %s222_s12, 4  ;;  %s34_s13 = int_to_ptr.vmem [resolvable:$true] %s33_s13 }
   0x3   :  { %s186_s14 = scalar_lea.vmem %s34_s13, 128  ;;  %p191_p1 = scmp.lt.s32.totalorder %s34_s13, %s34_s13 }
   0x4   :  { %p187_p0 = scmp.ne.s32.totalorder %s34_s13, %s186_s14  ;;  %p192_p2 = scmp.lt.s32.totalorder %s186_s14, %s186_s14 }
   0x6   :  { %p193_p3 = por %p192_p2, %p191_p1 }
   0x8   :  { %p194_p4 = pnand %p193_p3, %p187_p0 }
   0xa   :  { %197 = shalt.err (!%p194_p4)
}
   0xb   :  { %36 = dma.hbm_to_vmem [thread:$0]  %s261_s1, 128, %s34_s13, [#allocation4]  }
   0xc   :  { %218 = dma.done.wait [#allocation4], 128  }
   0xd   :  { %219 = vsyncadd [#allocation4], 4294967168  ;;  %v95_v0 = vld [vmem:[%s260_s0] sm:$0xff]  ;;  %v96_v1 = vld [vmem:[#allocation3] sm:$0xff]  ;;  %vm100_vm0 = vcmask 261120   ;;  %vm93_vm1 = vcmask 7168  }
   0xe   :  { %v97_v2 = vsub.f32 %v95_v0, %v96_v1  ;;  %v223_v6 = vmov 0.0   ;;  %v111_v13 = vld [vmem:[%s262_s2] sm:$0xff]  ;;  %s224_s19 = smov [#allocation6]   ;;  %vm142_vm4 = vcmask 0  }
   0xf   :  { %94 = vst.msk [vmem:[#allocation2] sm:$0xff] %vm93_vm1, %v223_v6  ;;  %v114_v16 = vsub.f32 1.0, %v111_v13  ;;  %s150_s2 = sshll.u32 %s224_s19, 4  ;;  %s151_s2 = int_to_ptr.vmem [resolvable:$true] %s150_s2 }
  0x10   :  { %v98_v3 = vadd.f32 1e-06, %v97_v2  ;;  %s198_s20 = scalar_lea.vmem %s151_s2, 16  ;;  %s202_s21 = scalar_lea.vmem %s151_s2, 32 }
  0x11   :  { %p199_p5 = scmp.ne.s32.totalorder %s151_s2, %s198_s20  ;;  %p203_p6 = scmp.lt.s32.totalorder %s151_s2, %s151_s2 }
  0x12   :  { %v99_v4 = vmul.f32 %v98_v3, %v98_v3  ;;  %p204_p7 = scmp.lt.s32.totalorder %s202_s21, %s198_s20 }
  0x14   :  { %v101_v5 = vsel %vm100_vm0, %v99_v4, 0.0  ;;  %p205_p8 = por %p204_p7, %p203_p6 }
  0x15   :  { %102 = vadd.xlane.f32.xlu0 %v101_v5 }
  0x16   :  { %v127_v20 = vld [vmem:[#allocation2] sm:$0xff]  ;;  %p206_p9 = pnand %p205_p8, %p199_p5 }
  0x9e   :  { %v103_v7 = vpop.xlane.xlu0 %102 }
  0x9f   :  { %176 = vrsqrt.f32 %v103_v7  ;;  %vm106_vm2 = vcmp.eq.f32.partialorder %v103_v7, inf  ;;  %v109_v10 = vand.u32 2147483648, %v103_v7  ;;  %vm108_vm3 = vcmp.eq.f32.partialorder %v103_v7, 0.0 }
  0xa0   :  { %v115_v18 = vmul.f32 %v114_v16, %v103_v7 }
  0xac   :  { %v177_v8 = vpop.eup %176 }
  0xad   :  { %v105_v9 = vmul.f32 %v177_v8, %v103_v7 }
  0xaf   :  { %v107_v11 = vsel %vm106_vm2, %v103_v7, %v105_v9 }
  0xb0   :  { %v110_v12 = vsel %vm108_vm3, %v109_v10, %v107_v11 }
  0xb1   :  { %v112_v14 = vsub.f32 2.0, %v110_v12 }
  0xb3   :  { %v113_v15 = vmax.f32 %v112_v14, 0.0 }
  0xb5   :  { %v116_v17 = vmul.f32 %v113_v15, %v113_v15 }
  0xb7   :  { %v117_v19 = vmul.f32 %v116_v17, %v111_v13 }
  0xb9   :  { %v118_v21 = vadd.f32 %v117_v19, %v115_v18 }
  0xbb   :  { %v128_v22 = vadd.f32 %v127_v20, %v118_v21 }
  0xbd   :  { %130 = vst.msk [vmem:[#allocation2] sm:$0xff] %vm93_vm1, %v128_v22 }
  0xc4   :  { %v134_v23 = vld [vmem:[#allocation2] sm:$0xff] }
  0xc5   :  { %v135_v24 = vsel %vm93_vm1, %v134_v23, 0.0 }
  0xc6   :  { %v136_v25 = vrot.slane %v135_v24, 4 }
  0xc8   :  { %v137_v26 = vadd.f32 %v136_v25, %v135_v24 }
  0xca   :  { %v138_v27 = vrot.slane %v137_v26, 2 }
  0xcc   :  { %v139_v28 = vadd.f32 %v138_v27, %v137_v26 }
  0xce   :  { %v140_v29 = vrot.slane %v139_v28, 1 }
  0xd0   :  { %v141_v30 = vadd.f32 %v140_v29, %v139_v28 }
  0xd2   :  { %143 = vst.msk [vmem:[#allocation6] sm:$0x1] %vm142_vm4, %v141_v30 }
  0xd3   :  { %209 = shalt.err (!%p206_p9)
}
  0xd4   :  { %153 = dma.vmem_to_hbm [thread:$0]  %s151_s2, 16, %s263_s3, [#allocation5]  }
  0xd5   :  { %220 = dma.done.wait [#allocation5], 16  }
  0xd6   :  { %221 = vsyncadd [#allocation5], 4294967280 }
  0xd7   :  { %157 = vsyncpa [#allocation4], 1 }
  0xd8   :  { %158 = vsyncpa [#allocation5], 1 }

</bundles_post_ra>
